<compile_context>
chip_gen: v5e
topology: v5e:2x2
jax: 0.10.0
libtpu: 0.0.40
codegen_flags: <defaults>
</compile_context>

<pallas_src>
import functools

import jax
import jax.numpy as jnp
from jax.experimental import pallas as pl
from jax.experimental.pallas import tpu as pltpu

LANE = 128  # lane-dense padded label dimension


def _classify_kernel(h_ref, wt_ref, b_ref, pool_ref, o_ref, *, inv_s):
    """Fused (mean-pool ∘ linear head) on one batch tile.

    h_ref:    [B_TILE*S, H]       bf16   flattened last_hidden_state rows
    wt_ref:   [H, 128]            bf16   pre-transposed, lane-padded classifier weight
    b_ref:    [1, 128]            f32    lane-padded classifier bias
    pool_ref: [B_TILE, B_TILE*S]  bf16   block-diagonal ONES segment-sum matrix
    o_ref:    [B_TILE, 128]       f32    lane-dense logits block
    """
    # Segment-sum over the S rows of each batch element on the MXU (bf16 operands,
    # f32 accumulation); exact-in-bf16 ones matrix, 1/S applied in f32 afterwards.
    pooled = jnp.dot(pool_ref[...], h_ref[...],
                     preferred_element_type=jnp.float32) * inv_s       # [B_TILE, H] f32
    # Classifier head on the (now tiny) pooled rows, lane-dense epilogue + bias.
    logits = jnp.dot(pooled.astype(jnp.bfloat16), wt_ref[...],
                     preferred_element_type=jnp.float32)               # [B_TILE, 128] f32
    o_ref[...] = logits + b_ref[...]


def ecg_llama_classification_head(last_hidden_state, classifier_w, classifier_b,
                                  *, b_tile=8):
    """Pallas wrapper: last_hidden_state [B, S, H] -> logits [B, num_labels] (bf16)."""
    B, S, H = last_hidden_state.shape
    L = classifier_w.shape[0]
    LP = LANE

    # ---- one-time (frozen-parameter) layout plumbing, outside the kernel ----
    # Pre-transpose + lane-pad the classifier weight: [L, H] -> [H, 128] bf16.
    w_t = jnp.zeros((H, LP), dtype=jnp.bfloat16).at[:, :L].set(
        classifier_w.astype(jnp.bfloat16).T)
    # Lane-padded f32 bias row.
    b_pad = jnp.zeros((1, LP), dtype=jnp.float32).at[:, :L].set(
        classifier_b.astype(jnp.float32).reshape(1, L))
    # Block-diagonal ONES segment-sum matrix for one batch tile (exact in bf16).
    rows = b_tile * S
    pool = ((jnp.arange(rows)[None, :] // S) == jnp.arange(b_tile)[:, None]
            ).astype(jnp.bfloat16)                                      # [b_tile, rows]

    # Pad batch to a multiple of b_tile so each grid step sees a full tile.
    Bp = ((B + b_tile - 1) // b_tile) * b_tile
    h = last_hidden_state.astype(jnp.bfloat16)
    if Bp != B:
        h = jnp.zeros((Bp, S, H), jnp.bfloat16).at[:B].set(h)
    # Flatten [Bp, S, H] -> [Bp*S, H] in plain JAX (HBM-side reshape is free).
    h2d = h.reshape(Bp * S, H)

    grid = (Bp // b_tile,)

    # Size the scoped-VMEM request: double-buffered h block + resident weights,
    # with headroom, capped at 32 MiB (safe on v5e/v6e/v7x).
    h_blk_bytes = rows * H * 2
    fixed_bytes = H * LP * 2 + LP * 4 + b_tile * rows * 2 + 2 * b_tile * LP * 4
    vmem_bytes = int(min(max(2 * (2 * h_blk_bytes + fixed_bytes), 16 << 20), 32 << 20))

    kernel = functools.partial(_classify_kernel, inv_s=1.0 / S)

    out = pl.pallas_call(
        kernel,
        out_shape=jax.ShapeDtypeStruct((Bp, LP), jnp.float32),
        grid_spec=pltpu.PrefetchScalarGridSpec(
            num_scalar_prefetch=0,
            grid=grid,
            in_specs=[
                # Streamed batch tile of flattened hidden states.
                pl.BlockSpec((rows, H), lambda i: (i, 0)),
                # Frozen operands: same block every step (stay resident in VMEM).
                pl.BlockSpec((H, LP), lambda i: (0, 0)),
                pl.BlockSpec((1, LP), lambda i: (0, 0)),
                pl.BlockSpec((b_tile, rows), lambda i: (0, 0)),
            ],
            out_specs=pl.BlockSpec((b_tile, LP), lambda i: (i, 0)),
        ),
        compiler_params=pltpu.CompilerParams(
            dimension_semantics=("parallel",),
            vmem_limit_bytes=vmem_bytes,
        ),
    )(h2d, w_t, b_pad, pool)

    # Slice away batch / lane padding; match torch half-precision logits.
    return out[:B, :L].astype(jnp.bfloat16)


def synthetic_base_model(input_ids, attention_mask, embed_table):
    """Deterministic stand-in for the frozen pretrained Llama body.

    Returns a synthetic last_hidden_state of shape [B, S, H] in bf16.
    """
    # TODO(synk): the pretrained meta-llama/Llama-3.2-3B transformer stack cannot be
    # reproduced in a self-contained synthetic script; an embedding lookup stands in
    # for outputs.last_hidden_state here.
    del attention_mask  # HF Llama returns hidden states for all positions; mask only gates attention.
    return embed_table[input_ids]  # [B, S, H] bf16 (plain-JAX glue / gather)


if __name__ == "__main__":
    key = jax.random.PRNGKey(0)

    # Small shapes consistent with the module's forward:
    #   max_length=10 from pre_process_data_llama, num_labels=4; hidden shrunk for the demo.
    B, S, H, L, V = 2, 10, 128, 4, 64

    k_ids, k_emb, k_w, k_b = jax.random.split(key, 4)

    input_ids = jax.random.randint(k_ids, (B, S), 0, V, dtype=jnp.int32)
    attention_mask = jnp.ones((B, S), dtype=jnp.int32)

    # Deterministic parameter init (synthetic, not a checkpoint load).
    embed_table = (jax.random.normal(k_emb, (V, H), dtype=jnp.float32) * 0.02).astype(jnp.bfloat16)
    classifier_w = (jax.random.normal(k_w, (L, H), dtype=jnp.float32) * 0.05).astype(jnp.bfloat16)
    classifier_b = jax.random.normal(k_b, (L,), dtype=jnp.float32) * 0.01

    # Forward pass.
    last_hidden_state = synthetic_base_model(input_ids, attention_mask, embed_table)  # [B, S, H]
    logits = ecg_llama_classification_head(last_hidden_state, classifier_w, classifier_b)  # [B, L]
    logits = jax.block_until_ready(logits)

    # Reference check in plain JAX (same math, f32): unmasked mean over S, then linear head.
    ref = jnp.mean(last_hidden_state.astype(jnp.float32), axis=1) @ classifier_w.astype(jnp.float32).T
    ref = ref + classifier_b
    assert logits.shape == (B, L)
    assert jnp.allclose(logits.astype(jnp.float32), ref, atol=1e-2, rtol=1e-2)

    print("KERNEL_OK")
</pallas_src>

<mosaic_0001>
module attributes {stable_mosaic.version = 11 : i64} {
  func.func @_classify_kernel(%arg0: i32, %arg1: memref<80x128xbf16, #tpu.memory_space<vmem>>, %arg2: memref<128x128xbf16, #tpu.memory_space<vmem>>, %arg3: memref<1x128xf32, #tpu.memory_space<vmem>>, %arg4: memref<8x80xbf16, #tpu.memory_space<vmem>>, %arg5: memref<8x128xf32, #tpu.memory_space<vmem>>) attributes {dimension_semantics = [#tpu.dimension_semantics<parallel>], iteration_bounds = array<i64: 1>, scalar_prefetch = 0 : i64, scratch_operands = 0 : i64, tpu.core_type = #tpu.core_type<tc>, window_params = [{transform_indices = @transform_0, window_bounds = array<i64: 80, 128>}, {pipeline_mode = #tpu.pipeline_mode<synchronous>, transform_indices = @transform_1, window_bounds = array<i64: 128, 128>}, {pipeline_mode = #tpu.pipeline_mode<synchronous>, transform_indices = @transform_2, window_bounds = array<i64: 1, 128>}, {pipeline_mode = #tpu.pipeline_mode<synchronous>, transform_indices = @transform_3, window_bounds = array<i64: 8, 80>}, {transform_indices = @transform_4, window_bounds = array<i64: 8, 128>}]} {
    %c0 = arith.constant 0 : index
    %c0_0 = arith.constant 0 : index
    %0 = vector.load %arg4[%c0, %c0_0] : memref<8x80xbf16, #tpu.memory_space<vmem>>, vector<8x80xbf16>
    %c0_1 = arith.constant 0 : index
    %c0_2 = arith.constant 0 : index
    %1 = vector.load %arg1[%c0_1, %c0_2] : memref<80x128xbf16, #tpu.memory_space<vmem>>, vector<80x128xbf16>
    %cst = arith.constant dense<0.000000e+00> : vector<8x128xf32>
    %2 = tpu.matmul %0, %1, %cst {dimension_numbers = #tpu.dot_dimension_numbers<[1], [0], [0], [1], [0, 0, 1, 1], [], []>} : vector<8x80xbf16>, vector<80x128xbf16>, vector<8x128xf32> -> vector<8x128xf32>
    %cst_3 = arith.constant 1.000000e-01 : f32
    %3 = vector.broadcast %cst_3 : f32 to vector<8x128xf32>
    %4 = arith.mulf %2, %3 : vector<8x128xf32>
    %5 = arith.truncf %4 : vector<8x128xf32> to vector<8x128xbf16>
    %c0_4 = arith.constant 0 : index
    %c0_5 = arith.constant 0 : index
    %6 = vector.load %arg2[%c0_4, %c0_5] : memref<128x128xbf16, #tpu.memory_space<vmem>>, vector<128x128xbf16>
    %cst_6 = arith.constant dense<0.000000e+00> : vector<8x128xf32>
    %7 = tpu.matmul %5, %6, %cst_6 {dimension_numbers = #tpu.dot_dimension_numbers<[1], [0], [0], [1], [0, 0, 1, 1], [], []>} : vector<8x128xbf16>, vector<128x128xbf16>, vector<8x128xf32> -> vector<8x128xf32>
    %c0_7 = arith.constant 0 : index
    %c0_8 = arith.constant 0 : index
    %8 = vector.load %arg3[%c0_7, %c0_8] : memref<1x128xf32, #tpu.memory_space<vmem>>, vector<1x128xf32>
    %9 = vector.broadcast %8 : vector<1x128xf32> to vector<8x128xf32>
    %10 = arith.addf %7, %9 : vector<8x128xf32>
    %c0_9 = arith.constant 0 : index
    %c0_10 = arith.constant 0 : index
    %11 = vector.load %arg5[%c0_9, %c0_10] : memref<8x128xf32, #tpu.memory_space<vmem>>, vector<8x128xf32>
    tpu.vector_store %arg5[%c0_9, %c0_10], %10 {strides = array<i32>} : memref<8x128xf32, #tpu.memory_space<vmem>>, vector<8x128xf32>,
    return
  }
  func.func @transform_0(%arg0: i32) -> (i32, i32) {
    %c0_i32 = arith.constant 0 : i32
    %c0_i32_0 = arith.constant 0 : i32
    return %arg0, %c0_i32 : i32, i32
  }
  func.func @transform_1(%arg0: i32) -> (i32, i32) {
    %c0_i32 = arith.constant 0 : i32
    %c0_i32_0 = arith.constant 0 : i32
    %c0_i32_1 = arith.constant 0 : i32
    return %c0_i32, %c0_i32_0 : i32, i32
  }
  func.func @transform_2(%arg0: i32) -> (i32, i32) {
    %c0_i32 = arith.constant 0 : i32
    %c0_i32_0 = arith.constant 0 : i32
    %c0_i32_1 = arith.constant 0 : i32
    return %c0_i32, %c0_i32_0 : i32, i32
  }
  func.func @transform_3(%arg0: i32) -> (i32, i32) {
    %c0_i32 = arith.constant 0 : i32
    %c0_i32_0 = arith.constant 0 : i32
    %c0_i32_1 = arith.constant 0 : i32
    return %c0_i32, %c0_i32_0 : i32, i32
  }
  func.func @transform_4(%arg0: i32) -> (i32, i32) {
    %c0_i32 = arith.constant 0 : i32
    %c0_i32_0 = arith.constant 0 : i32
    return %arg0, %c0_i32 : i32, i32
  }
}

</mosaic_0001>

<bundles_post_ra>
// kernel: tpu_custom_call.1
= control target key start
LH: loop header
LB: loop body
LE: loop exit
PB: predicated region body
PF: predicated region fallthrough
CT: control target
= control target key end

     0   :  { %9 = vsyncpa [#allocation3], 0  ;;  %s445_s0 = inlined_call_operand.hbm [shape: bf16[80,128], index: 0, kind: input, shape index: {}]   ;;  %s446_s1 = inlined_call_operand.hbm [shape: bf16[128,128], index: 1, kind: input, shape index: {}]   ;;  %s447_s2 = inlined_call_operand.vmem [shape: f32[1,128], index: 2, kind: input, shape index: {}]   ;;  %s448_s3 = inlined_call_operand.hbm [shape: bf16[8,80], index: 3, kind: input, shape index: {}]   ;;  %s449_s4 = inlined_call_operand.hbm [shape: f32[8,128], index: 4, kind: output, shape index: {}]  }
   0x1   :  { %10 = vsyncpa [#allocation6], 0 }
   0x2   :  { %11 = vsyncpa [#allocation4], 0  ;;  %s29_s17 = sshll.u32 %s446_s1, 4  ;;  %s399_s18 = smov [#allocation5]   ;;  %s30_s17 = int_to_ptr.hbm [resolvable:$true] %s29_s17 }
   0x3   :  { %s31_s19 = sshll.u32 %s399_s18, 4  ;;  %s16_s22 = sshll.u32 %s445_s0, 4  ;;  %s32_s19 = int_to_ptr.vmem [resolvable:$true] %s31_s19  ;;  %s17_s22 = int_to_ptr.hbm [resolvable:$true] %s16_s22 }
   0x4   :  { %s400_s23 = smov 64   ;;  %s401_s24 = smov 4  }
   0x5   :  { %37 = dma.hbm_to_vmem [thread:$0]  %s30_s17, 1024, %s32_s19, [#allocation6], %s400_s23, %s400_s23, %s401_s24  }
   0x6   :  { %s402_s25 = smov [#allocation2]   ;;  %s45_s29 = sshll.u32 %s448_s3, 4  ;;  %s46_s29 = int_to_ptr.hbm [resolvable:$true] %s45_s29 }
   0x7   :  { %s18_s26 = sshll.u32 %s402_s25, 4  ;;  %s403_s1 = smov [#allocation7]   ;;  %s19_s26 = int_to_ptr.vmem [resolvable:$true] %s18_s26 }
   0x8   :  { %24 = dma.hbm_to_vmem [thread:$0]  %s17_s22, 640, %s19_s26, [#allocation3], %s400_s23, %s400_s23, %s401_s24  }
   0x9   :  { %s47_s30 = sshll.u32 %s403_s1, 4  ;;  %s48_s30 = int_to_ptr.vmem [resolvable:$true] %s47_s30 }
   0xa   :  { %50 = dma.hbm_to_vmem [thread:$0]  %s46_s29, 64, %s48_s30, [#allocation6]  }
   0xb   :  { %393 = dma.done.wait [#allocation3], 640  }
   0xc   :  { %394 = vsyncadd [#allocation3], 4294966656 }
   0xd   :  { %395 = dma.done.wait [#allocation6], 1088  }
   0xe   :  { %396 = vsyncadd [#allocation6], 4294966208  ;;  %v281_v0 = vld [vmem:[#allocation2 + $0x20] sm:$0xff]  ;;  %v280_v1 = vld [vmem:[#allocation2 + $0x18] sm:$0xff]  ;;  %vm105_vm0 = vcmask 654336   ;;  %s404_s5 = smov [#allocation8]  }
   0xf   :  { %112 = vmatpush.bf16.msra.mxu0 %v281_v0  ;;  %v289_v2 = vld [vmem:[#allocation5 + $0x38] sm:$0xff]  ;;  %v288_v3 = vld [vmem:[#allocation5 + $0x30] sm:$0xff]  ;;  %v279_v4 = vld [vmem:[#allocation2 + $0x10] sm:$0xff]  ;;  %s211_s6 = sshll.u32 %s404_s5, 4  ;;  %s213_s9 = sshll.u32 %s449_s4, 4  ;;  %s212_s6 = int_to_ptr.vmem [resolvable:$true] %s211_s6  ;;  %s214_s9 = int_to_ptr.hbm [resolvable:$true] %s213_s9 }
  0x10   :  { %192 = vmatpush.bf16.msra.mxu1 %v289_v2  ;;  %v287_v5 = vld [vmem:[#allocation5 + $0x28] sm:$0xff]  ;;  %v278_v6 = vld [vmem:[#allocation2 + $0x8] sm:$0xff]  ;;  %v277_v8 = vld [vmem:[#allocation2] sm:$0xff] }
  0x11   :  { %v286_v7 = vld [vmem:[#allocation5 + $0x20] sm:$0xff]  ;;  %v285_v9 = vld [vmem:[#allocation5 + $0x18] sm:$0xff]  ;;  %v284_v11 = vld [vmem:[#allocation5 + $0x10] sm:$0xff] }
  0x12   :  { %v64_v10 = vld [vmem:[#allocation7] sm:$0xf]  ;;  %v283_v12 = vld [vmem:[#allocation5 + $0x8] sm:$0xff]  ;;  %v296_v18 = vld [vmem:[%s447_s2] ss:$0 sm:$0xff] }
  0x13   :  { %113 = vmatpush.bf16.msra.mxu0 %v280_v1  ;;  %v282_v13 = vld [vmem:[#allocation5] sm:$0xff] }
  0x14   :  { %193 = vmatpush.bf16.msra.mxu1 %v288_v3 }
  0x17   :  { %114 = vmatpush.bf16.msra.mxu0 %v279_v4 }
  0x18   :  { %194 = vmatpush.bf16.msra.mxu1 %v287_v5 }
  0x1b   :  { %115 = vmatpush.bf16.msra.mxu0 %v278_v6 }
  0x1c   :  { %195 = vmatpush.bf16.msra.mxu1 %v286_v7 }
  0x1f   :  { %116 = vmatpush.bf16.msra.mxu0 %v277_v8 }
  0x20   :  { %196 = vmatpush.bf16.msra.mxu1 %v285_v9 }
  0x22   :  { %244 = vmatmul.msk.bf16.vlgmr.msra.gmra.mxu0 %vm105_vm0, %v64_v10 }
  0x24   :  { %197 = vmatpush.bf16.msra.mxu1 %v284_v11 }
  0x28   :  { %198 = vmatpush.bf16.msra.mxu1 %v283_v12 }
  0x2c   :  { %199 = vmatpush.bf16.msra.mxu1 %v282_v13 }
  0x9f   :  { %v118_v14 = vpop.f32.mrf.mxu0 }
  0xa0   :  { %v122_v15 = vmul.f32 0.1, %v118_v14 }
  0xa2   :  { %v123_v16 = vpack.c.bf16 %v122_v15, %v122_v15 }
  0xa4   :  { %200 = vmatmul.bf16.vlgmr.msra.gmra.mxu1 %v123_v16 }
  0xa7   :  { %v120_v17 = vpop.f32.mrf.mxu0 }
 0x121   :  { %v201_v19 = vpop.f32.mrf.mxu1 }
 0x122   :  { %v202_v20 = vadd.f32 %v296_v18, %v201_v19 }
 0x124   :  { %205 = vst [vmem:[#allocation8] sm:$0xff] %v202_v20 }
 0x125   :  { %216 = dma.vmem_to_hbm [thread:$0]  %s212_s6, 128, %s214_s9, [#allocation4]  }
 0x129   :  { %v203_v21 = vpop.f32.mrf.mxu1 }
 0x12a   :  { %397 = dma.done.wait [#allocation4], 128  }
 0x12b   :  { %398 = vsyncadd [#allocation4], 4294967168 }
 0x12c   :  { %221 = vsyncpa [#allocation3], 1 }
 0x12d   :  { %222 = vsyncpa [#allocation6], 1 }
 0x12e   :  { %223 = vsyncpa [#allocation4], 1 }

</bundles_post_ra>
